<compile_context>
chip_gen: v6e
topology: v6e:2x2x1
jax: 0.10.0
libtpu: 0.0.40
codegen_flags: <defaults>
</compile_context>

<pallas_src>
import jax
import jax.numpy as jnp
from jax.experimental import pallas as pl
from jax.experimental.pallas import tpu as pltpu


# ------------------------------------------------------------------ shared math / layout glue
def _elu(x):
    # ELU(alpha=1).  Written as exp(x)-1 so the identical expression lowers on
    # the Mosaic EUP inside kernels and in the plain-JAX reference.
    # ELU(0) == 0, so zero spatial padding before/after ELU is equivalent.
    return jnp.where(x > 0.0, x, jnp.exp(x) - 1.0)


def _im2col_nhwc(x, kh, kw, pad):
    """NHWC -> (B*H*W, kh*kw*C) patch matrix, stride 1, zero padding.
    K ordering: k = (i*kw + j)*C + c (matches the prepared weight layout)."""
    B, H, W, C = x.shape
    xp = jnp.pad(x, ((0, 0), (pad, pad), (pad, pad), (0, 0)))
    cols = []
    for i in range(kh):
        for j in range(kw):
            cols.append(xp[:, i:i + H, j:j + W, :])
    return jnp.concatenate(cols, axis=-1).reshape(B * H * W, kh * kw * C)


def space_to_depth(x, bs=2):
    """NHWC SpaceToDepth, depth index = (sub_h*bs + sub_w)*C + c (VUNet order)."""
    B, H, W, C = x.shape
    x = x.reshape(B, H // bs, bs, W // bs, bs, C).transpose(0, 1, 3, 2, 4, 5)
    return x.reshape(B, H // bs, W // bs, bs * bs * C)


def depth_to_space(x, bs=2):
    """NHWC inverse of space_to_depth (matches VUNet's DepthToSpace)."""
    B, dH, dW, D = x.shape
    C = D // (bs * bs)
    x = x.reshape(B, dH, dW, bs, bs, C).transpose(0, 1, 3, 2, 4, 5)
    return x.reshape(B, dH * bs, dW * bs, C)


def latent_sample(key, mean):
    """MultivariateNormal(0, I).sample() + mean == iid N(0,1) + mean (H=W=1)."""
    B, H, W, C = mean.shape
    noise = jax.random.normal(key, (B, C), jnp.float32)
    return (mean.reshape(B, C) + noise).reshape(B, 1, 1, C)


# ------------------------------------------------------------------ Pallas kernels
def _mm(x, w):
    """bf16 MXU matmul with f32 accumulation (activation cast fused in-kernel)."""
    return jnp.dot(x.astype(jnp.bfloat16), w, preferred_element_type=jnp.float32)


def _conv_pre_kernel(a_ref, w_ref, off_ref, o_ref):
    # NormConv2d 1x1 with fused ELU prologue: ELU(a) @ (gamma*W) + (gamma*b + beta)
    o_ref[...] = _mm(_elu(a_ref[...]), w_ref[...]) + off_ref[...]


def _res_conv_kernel(px_ref, pa_ref, wx_ref, wa_ref, off_ref, res_ref, o_ref):
    # VUnetResnetBlock tail: x + conv(ELU(cat(x, a))).  The concat's K axis is
    # pre-split into its x / a halves, so no XLA concat or standalone ELU pass.
    o_ref[...] = (res_ref[...] + off_ref[...]
                  + _mm(_elu(px_ref[...]), wx_ref[...])
                  + _mm(_elu(pa_ref[...]), wa_ref[...]))


def _stage_head_kernel(x2_ref, x1_ref, noise_ref,
                       wc1_ref, oc1_ref,            # conv1x1
                       wp_ref, op_ref,              # blocks[0].pre
                       wrx_ref, wra_ref, orc_ref,   # blocks[0].conv2d (centre tap, split)
                       h_ref, z_ref):
    # Deepest stage head (1x1 spatial): h = conv1x1(x2); h = ResBlock0(h, x1); z = h + N(0,I)
    h0 = _mm(x2_ref[...], wc1_ref[...]) + oc1_ref[...]
    a2 = _mm(_elu(x1_ref[...]), wp_ref[...]) + op_ref[...]
    h = (h0 + orc_ref[...]
         + _mm(_elu(h0), wrx_ref[...])
         + _mm(_elu(a2), wra_ref[...]))
    h_ref[...] = h
    z_ref[...] = h + noise_ref[...]


def _stage_tail_kernel(h_ref, x1_ref, z_ref,
                       wcs_ref, wcz_ref, ocn_ref,   # channel_norm (split: [x1 | z])
                       wp_ref, op_ref,              # blocks[1].pre
                       wrx_ref, wra_ref, orc_ref,   # blocks[1].conv2d (centre tap, split)
                       wu_ref, ou_ref,              # Upsample conv (centre tap)
                       o_ref):
    # Deepest stage tail (1x1 spatial): gz = channel_norm(cat(x1, z));
    # h = ResBlock1(h, gz); h = Upsample.op(h)
    gz = _mm(x1_ref[...], wcs_ref[...]) + _mm(z_ref[...], wcz_ref[...]) + ocn_ref[...]
    a2 = _mm(_elu(gz), wp_ref[...]) + op_ref[...]
    h = h_ref[...]
    h = (h + orc_ref[...]
         + _mm(_elu(h), wrx_ref[...])
         + _mm(_elu(a2), wra_ref[...]))
    o_ref[...] = _mm(h, wu_ref[...]) + ou_ref[...]


_VMEM = pl.BlockSpec(memory_space=pltpu.MemorySpace.VMEM)


def _pallas(kernel, args, out_shape):
    """Single-step pallas_call: whole (tiny) operands live in VMEM — no grid,
    no K loop, no padding, no scratch."""
    if isinstance(out_shape, (tuple, list)):
        out_specs = tuple(_VMEM for _ in out_shape)
        out_shape = tuple(out_shape)
    else:
        out_specs = _VMEM
    return pl.pallas_call(
        kernel,
        out_shape=out_shape,
        in_specs=[_VMEM] * len(args),
        out_specs=out_specs,
    )(*args)


# ------------------------------------------------------------------ NormConv2d parameters
def init_norm_conv(key, c_in, c_out, k):
    """PyTorch-like raw parameters (weight_norm v/g, bias, gamma, beta)."""
    kv, kb = jax.random.split(key)
    v = jax.random.normal(kv, (c_out, c_in, k, k), jnp.float32) * 0.1
    g = jnp.sqrt(jnp.sum(v * v, axis=(1, 2, 3)))          # weight_norm init: g = ||v||
    b = jax.random.normal(kb, (c_out,), jnp.float32) * 0.05
    gamma = jnp.ones((c_out,), jnp.float32)                # NormConv2d learned scale
    beta = jnp.zeros((c_out,), jnp.float32)                # NormConv2d learned shift
    return dict(v=v, g=g, b=b, gamma=gamma, beta=beta)


def prepare_norm_conv(p):
    """One-time lowering: weight-norm, gamma/bias folding, matmul layout,
    centre-tap extraction, bf16 cast.
    out = gamma*(W x + b) + beta == x @ (gamma*W) + (gamma*b + beta)."""
    v, g, b, gamma, beta = p["v"], p["g"], p["b"], p["gamma"], p["beta"]
    c_out, c_in, kh, kw = v.shape
    vnorm = jnp.sqrt(jnp.sum(v * v, axis=(1, 2, 3), keepdims=True))
    w = (g[:, None, None, None] / vnorm) * v                        # weight_norm
    w_mat = w.transpose(2, 3, 1, 0).reshape(kh * kw * c_in, c_out)  # k = (i*kw+j)*c_in + c
    w_mat = w_mat * gamma[None, :]                                  # fold gamma into W
    off = (gamma * b + beta).reshape(1, c_out)                      # gamma*b + beta
    centre = (kh // 2) * kw + (kw // 2)
    wc = w_mat.reshape(kh * kw, c_in, c_out)[centre]                # centre tap
    return dict(w=w_mat.astype(jnp.bfloat16), wc=wc.astype(jnp.bfloat16),
                w32=w_mat, off=off, kh=kh, kw=kw, c_in=c_in, c_out=c_out)


def _split_conv(cprep, c_first):
    """Pre-split a conv's K axis by input channel (first c_first channels vs the
    rest) so the channel concat never has to be materialised."""
    kh, kw, c_in, c_out = cprep["kh"], cprep["kw"], cprep["c_in"], cprep["c_out"]
    w = cprep["w"].reshape(kh * kw, c_in, c_out)
    cprep.update(
        w_x=w[:, :c_first, :].reshape(kh * kw * c_first, c_out),
        w_a=w[:, c_first:, :].reshape(kh * kw * (c_in - c_first), c_out),
        wc_x=cprep["wc"][:c_first], wc_a=cprep["wc"][c_first:])
    return cprep


def init_resblock(key, nf, ksize=3):
    k1, k2 = jax.random.split(key)
    return dict(pre=init_norm_conv(k1, nf, nf, 1),
                conv2d=init_norm_conv(k2, 2 * nf, nf, ksize))


def init_zconverter(key, nf):
    keys = jax.random.split(key, 6)
    return dict(blocks=[init_resblock(keys[i], nf) for i in range(3)],
                conv1x1=init_norm_conv(keys[3], nf, nf, 1),
                up_op=init_norm_conv(keys[4], nf, 4 * nf, 3),   # Upsample: conv3x3 -> 4nf, then d2s
                channel_norm=init_norm_conv(keys[5], 2 * nf, nf, 1))


def prepare_zconverter(model):
    nf = int(model["conv1x1"]["v"].shape[0])
    return dict(
        nf=nf,
        blocks=[dict(pre=prepare_norm_conv(b["pre"]),
                     conv2d=_split_conv(prepare_norm_conv(b["conv2d"]), nf))
                for b in model["blocks"]],
        conv1x1=prepare_norm_conv(model["conv1x1"]),
        up_op=prepare_norm_conv(model["up_op"]),
        channel_norm=_split_conv(prepare_norm_conv(model["channel_norm"]), nf))


# ------------------------------------------------------------------ forward (Pallas)
def resblock(rb, x, a):
    """VUnetResnetBlock(use_skip=True): x + conv2d(ELU(cat(x, pre(ELU(a))))).
    Two pallas_calls: fused pre conv, fused ELU/conv/offset/residual."""
    B, H, W, C = x.shape
    M = B * H * W
    c2 = rb["conv2d"]
    a2 = _pallas(_conv_pre_kernel,
                 (a.reshape(M, C), rb["pre"]["w"], rb["pre"]["off"]),
                 jax.ShapeDtypeStruct((M, rb["pre"]["c_out"]), jnp.float32))
    x_flat = x.reshape(M, C)
    if H == 1 and W == 1:
        # 3x3 / pad-1 conv on a 1x1 map: only the centre tap sees data.
        px, pa, wx, wa = x_flat, a2, c2["wc_x"], c2["wc_a"]
    else:
        # TODO(synk): im2col still built in XLA; a halo-tile conv kernel would
        # remove the kh*kw read amplification (spatial here is <= 2).
        pad = c2["kh"] // 2
        px = _im2col_nhwc(x, c2["kh"], c2["kw"], pad)
        pa = _im2col_nhwc(a2.reshape(B, H, W, C), c2["kh"], c2["kw"], pad)
        wx, wa = c2["w_x"], c2["w_a"]
    out = _pallas(_res_conv_kernel, (px, pa, wx, wa, c2["off"], x_flat),
                  jax.ShapeDtypeStruct((M, c2["c_out"]), jnp.float32))
    return out.reshape(B, H, W, c2["c_out"])


def zconverter_forward(prep, x_f_nchw, n_stages, sample_key):
    """ZConverter.forward.  Network runs NHWC (channels on the lane axis);
    NCHW <-> NHWC only at the module boundary."""
    nf = prep["nf"]
    xf = {k: jnp.transpose(v, (0, 2, 3, 1)) for k, v in x_f_nchw.items()}
    params, zs = {}, {}
    k0, k1 = jax.random.split(sample_key, 2)

    # ---- n = 0 : deepest stage, 1x1 spatial -> two fused pallas_calls ------
    s0 = f"s{n_stages}"
    x1, x2 = xf[s0 + "_1"], xf[s0 + "_2"]
    B, H, W, _ = x2.shape
    assert H == 1 and W == 1, "ZConverter's deepest stage must be 1x1 spatial"
    rb0, rb1 = prep["blocks"][0], prep["blocks"][1]
    cn, up = prep["channel_norm"], prep["up_op"]
    x1f, x2f = x1.reshape(B, nf), x2.reshape(B, nf)
    noise0 = jax.random.normal(k0, (B, nf), jnp.float32)

    shp = jax.ShapeDtypeStruct((B, nf), jnp.float32)
    h_flat, z_flat = _pallas(
        _stage_head_kernel,
        (x2f, x1f, noise0,
         prep["conv1x1"]["w"], prep["conv1x1"]["off"],
         rb0["pre"]["w"], rb0["pre"]["off"],
         rb0["conv2d"]["wc_x"], rb0["conv2d"]["wc_a"], rb0["conv2d"]["off"]),
        (shp, shp))
    params[s0] = h_flat.reshape(B, 1, 1, nf)            # spatial already 1 -> no s2d
    zs[s0] = z_flat.reshape(B, 1, 1, nf)

    hu = _pallas(
        _stage_tail_kernel,
        (h_flat, x1f, z_flat,
         cn["wc_x"], cn["wc_a"], cn["off"],
         rb1["pre"]["w"], rb1["pre"]["off"],
         rb1["conv2d"]["wc_x"], rb1["conv2d"]["wc_a"], rb1["conv2d"]["off"],
         up["wc"], up["off"]),
        jax.ShapeDtypeStruct((B, up["c_out"]), jnp.float32))
    h = depth_to_space(hu.reshape(B, 1, 1, up["c_out"]))            # Upsample

    # ---- n = 1 : next stage --------------------------------------------------
    s1 = f"s{n_stages - 1}"
    h = resblock(prep["blocks"][2], h, xf[s1 + "_1"])
    params[s1] = space_to_depth(h) if h.shape[2] != 1 else h
    if xf[s1 + "_2"].shape[2] > 1:
        z = depth_to_space(latent_sample(k1, space_to_depth(h)))
    else:
        z = latent_sample(k1, h)
    zs[s1] = z

    to_nchw = lambda t: jnp.transpose(t, (0, 3, 1, 2))
    return ({k: to_nchw(v) for k, v in params.items()},
            {k: to_nchw(v) for k, v in zs.items()})


# ------------------------------------------------------------------ plain-JAX f32 reference
def _ref_norm_conv(cprep, x, padding=0, elu=False):
    B, H, W, _ = x.shape
    if elu:
        x = _elu(x)
    if cprep["kh"] == 1 and cprep["kw"] == 1:
        patches = x.reshape(B * H * W, cprep["c_in"])
    else:
        patches = _im2col_nhwc(x, cprep["kh"], cprep["kw"], padding)
    y = jnp.dot(patches, cprep["w32"], precision="highest") + cprep["off"]
    return y.reshape(B, H, W, cprep["c_out"])


def _ref_resblock(rb, x, a):
    a = _ref_norm_conv(rb["pre"], a, 0, elu=True)
    xc = jnp.concatenate([x, a], axis=-1)
    return x + _ref_norm_conv(rb["conv2d"], xc, rb["conv2d"]["kh"] // 2, elu=True)


def zconverter_forward_ref(prep, x_f_nchw, n_stages, sample_key):
    """Direct f32 transcription of the PyTorch module (no Pallas) for checking."""
    xf = {k: jnp.transpose(v, (0, 2, 3, 1)) for k, v in x_f_nchw.items()}
    params, zs = {}, {}
    skeys = jax.random.split(sample_key, 2)
    h = _ref_norm_conv(prep["conv1x1"], xf[f"s{n_stages}_2"])
    for n, i_s in enumerate(range(n_stages, n_stages - 2, -1)):
        stage = f"s{i_s}"
        h = _ref_resblock(prep["blocks"][2 * n], h, xf[stage + "_1"])
        params[stage] = space_to_depth(h) if h.shape[2] != 1 else h
        if xf[stage + "_2"].shape[2] > 1:
            z = depth_to_space(latent_sample(skeys[n], space_to_depth(h)))
        else:
            z = latent_sample(skeys[n], h)
        zs[stage] = z
        if n == 0:
            gz = jnp.concatenate([xf[stage + "_1"], z], axis=-1)
            gz = _ref_norm_conv(prep["channel_norm"], gz)
            h = _ref_resblock(prep["blocks"][2 * n + 1], h, gz)
            h = depth_to_space(_ref_norm_conv(prep["up_op"], h, padding=1))
    to_nchw = lambda t: jnp.transpose(t, (0, 3, 1, 2))
    return ({k: to_nchw(v) for k, v in params.items()},
            {k: to_nchw(v) for k, v in zs.items()})


# ------------------------------------------------------------------ main
if __name__ == "__main__":
    key = jax.random.PRNGKey(0)
    B, nf, n_stages = 2, 32, 4
    k_param, k_data, k_sample = jax.random.split(key, 3)

    model = init_zconverter(k_param, nf)
    prep = prepare_zconverter(model)   # weight-norm / gamma-fold / split / bf16: done ONCE

    dkeys = jax.random.split(k_data, 4)
    # deepest stage (s4): 1x1 spatial; next stage (s3): 2x2 spatial (VUNet bottleneck)
    x_f = {
        f"s{n_stages}_1": jax.random.normal(dkeys[0], (B, nf, 1, 1), jnp.float32),
        f"s{n_stages}_2": jax.random.normal(dkeys[1], (B, nf, 1, 1), jnp.float32),
        f"s{n_stages - 1}_1": jax.random.normal(dkeys[2], (B, nf, 2, 2), jnp.float32),
        f"s{n_stages - 1}_2": jax.random.normal(dkeys[3], (B, nf, 2, 2), jnp.float32),
    }

    fwd = jax.jit(lambda xs, k: zconverter_forward(prep, xs, n_stages, k))
    params, zs = fwd(x_f, k_sample)
    jax.tree_util.tree_map(jax.block_until_ready, (params, zs))

    assert params[f"s{n_stages}"].shape == (B, nf, 1, 1)
    assert params[f"s{n_stages - 1}"].shape == (B, 4 * nf, 1, 1)
    assert zs[f"s{n_stages}"].shape == (B, nf, 1, 1)
    assert zs[f"s{n_stages - 1}"].shape == (B, nf, 2, 2)

    # Numerical check against the plain-JAX f32 transcription (same noise keys;
    # tolerance covers the bf16 MXU operands used inside the kernels).
    ref_params, ref_zs = jax.jit(
        lambda xs, k: zconverter_forward_ref(prep, xs, n_stages, k))(x_f, k_sample)
    for got, ref in ((params, ref_params), (zs, ref_zs)):
        for name in ref:
            assert jnp.allclose(got[name], ref[name], atol=1e-1, rtol=1e-1), name

    print("KERNEL_OK")
</pallas_src>

<mosaic_0001>
module attributes {stable_mosaic.version = 11 : i64} {
  func.func @_stage_head_kernel(%arg0: memref<2x32xf32, #tpu.memory_space<vmem>>, %arg1: memref<2x32xf32, #tpu.memory_space<vmem>>, %arg2: memref<2x32xf32, #tpu.memory_space<vmem>>, %arg3: memref<32x32xbf16, #tpu.memory_space<vmem>>, %arg4: memref<1x32xf32, #tpu.memory_space<vmem>>, %arg5: memref<32x32xbf16, #tpu.memory_space<vmem>>, %arg6: memref<1x32xf32, #tpu.memory_space<vmem>>, %arg7: memref<32x32xbf16, #tpu.memory_space<vmem>>, %arg8: memref<32x32xbf16, #tpu.memory_space<vmem>>, %arg9: memref<1x32xf32, #tpu.memory_space<vmem>>, %arg10: memref<2x32xf32, #tpu.memory_space<vmem>>, %arg11: memref<2x32xf32, #tpu.memory_space<vmem>>) attributes {dimension_semantics = [], scalar_prefetch = 0 : i64, scratch_operands = 0 : i64, tpu.core_type = #tpu.core_type<tc>} {
    %c0 = arith.constant 0 : index
    %c0_0 = arith.constant 0 : index
    %0 = vector.load %arg0[%c0, %c0_0] : memref<2x32xf32, #tpu.memory_space<vmem>>, vector<2x32xf32>
    %c0_1 = arith.constant 0 : index
    %c0_2 = arith.constant 0 : index
    %1 = vector.load %arg3[%c0_1, %c0_2] : memref<32x32xbf16, #tpu.memory_space<vmem>>, vector<32x32xbf16>
    %2 = arith.truncf %0 : vector<2x32xf32> to vector<2x32xbf16>
    %cst = arith.constant dense<0.000000e+00> : vector<2x32xf32>
    %3 = tpu.matmul %2, %1, %cst {dimension_numbers = #tpu.dot_dimension_numbers<[1], [0], [0], [1], [0, 0, 1, 1], [], []>} : vector<2x32xbf16>, vector<32x32xbf16>, vector<2x32xf32> -> vector<2x32xf32>
    %c0_3 = arith.constant 0 : index
    %c0_4 = arith.constant 0 : index
    %4 = vector.load %arg4[%c0_3, %c0_4] : memref<1x32xf32, #tpu.memory_space<vmem>>, vector<1x32xf32>
    %5 = vector.broadcast %4 : vector<1x32xf32> to vector<2x32xf32>
    %6 = arith.addf %3, %5 : vector<2x32xf32>
    %c0_5 = arith.constant 0 : index
    %c0_6 = arith.constant 0 : index
    %7 = vector.load %arg1[%c0_5, %c0_6] : memref<2x32xf32, #tpu.memory_space<vmem>>, vector<2x32xf32>
    %cst_7 = arith.constant 0.000000e+00 : f32
    %8 = vector.broadcast %cst_7 : f32 to vector<2x32xf32>
    %9 = arith.cmpf ogt, %7, %8 : vector<2x32xf32>
    %10 = math.exp %7 : vector<2x32xf32>
    %cst_8 = arith.constant 1.000000e+00 : f32
    %11 = vector.broadcast %cst_8 : f32 to vector<2x32xf32>
    %12 = arith.subf %10, %11 : vector<2x32xf32>
    %13 = arith.select %9, %7, %12 : vector<2x32xi1>, vector<2x32xf32>
    %c0_9 = arith.constant 0 : index
    %c0_10 = arith.constant 0 : index
    %14 = vector.load %arg5[%c0_9, %c0_10] : memref<32x32xbf16, #tpu.memory_space<vmem>>, vector<32x32xbf16>
    %15 = arith.truncf %13 : vector<2x32xf32> to vector<2x32xbf16>
    %cst_11 = arith.constant dense<0.000000e+00> : vector<2x32xf32>
    %16 = tpu.matmul %15, %14, %cst_11 {dimension_numbers = #tpu.dot_dimension_numbers<[1], [0], [0], [1], [0, 0, 1, 1], [], []>} : vector<2x32xbf16>, vector<32x32xbf16>, vector<2x32xf32> -> vector<2x32xf32>
    %c0_12 = arith.constant 0 : index
    %c0_13 = arith.constant 0 : index
    %17 = vector.load %arg6[%c0_12, %c0_13] : memref<1x32xf32, #tpu.memory_space<vmem>>, vector<1x32xf32>
    %18 = vector.broadcast %17 : vector<1x32xf32> to vector<2x32xf32>
    %19 = arith.addf %16, %18 : vector<2x32xf32>
    %c0_14 = arith.constant 0 : index
    %c0_15 = arith.constant 0 : index
    %20 = vector.load %arg9[%c0_14, %c0_15] : memref<1x32xf32, #tpu.memory_space<vmem>>, vector<1x32xf32>
    %21 = vector.broadcast %20 : vector<1x32xf32> to vector<2x32xf32>
    %22 = arith.addf %6, %21 : vector<2x32xf32>
    %cst_16 = arith.constant 0.000000e+00 : f32
    %23 = vector.broadcast %cst_16 : f32 to vector<2x32xf32>
    %24 = arith.cmpf ogt, %6, %23 : vector<2x32xf32>
    %25 = math.exp %6 : vector<2x32xf32>
    %cst_17 = arith.constant 1.000000e+00 : f32
    %26 = vector.broadcast %cst_17 : f32 to vector<2x32xf32>
    %27 = arith.subf %25, %26 : vector<2x32xf32>
    %28 = arith.select %24, %6, %27 : vector<2x32xi1>, vector<2x32xf32>
    %c0_18 = arith.constant 0 : index
    %c0_19 = arith.constant 0 : index
    %29 = vector.load %arg7[%c0_18, %c0_19] : memref<32x32xbf16, #tpu.memory_space<vmem>>, vector<32x32xbf16>
    %30 = arith.truncf %28 : vector<2x32xf32> to vector<2x32xbf16>
    %cst_20 = arith.constant dense<0.000000e+00> : vector<2x32xf32>
    %31 = tpu.matmul %30, %29, %cst_20 {dimension_numbers = #tpu.dot_dimension_numbers<[1], [0], [0], [1], [0, 0, 1, 1], [], []>} : vector<2x32xbf16>, vector<32x32xbf16>, vector<2x32xf32> -> vector<2x32xf32>
    %32 = arith.addf %22, %31 : vector<2x32xf32>
    %cst_21 = arith.constant 0.000000e+00 : f32
    %33 = vector.broadcast %cst_21 : f32 to vector<2x32xf32>
    %34 = arith.cmpf ogt, %19, %33 : vector<2x32xf32>
    %35 = math.exp %19 : vector<2x32xf32>
    %cst_22 = arith.constant 1.000000e+00 : f32
    %36 = vector.broadcast %cst_22 : f32 to vector<2x32xf32>
    %37 = arith.subf %35, %36 : vector<2x32xf32>
    %38 = arith.select %34, %19, %37 : vector<2x32xi1>, vector<2x32xf32>
    %c0_23 = arith.constant 0 : index
    %c0_24 = arith.constant 0 : index
    %39 = vector.load %arg8[%c0_23, %c0_24] : memref<32x32xbf16, #tpu.memory_space<vmem>>, vector<32x32xbf16>
    %40 = arith.truncf %38 : vector<2x32xf32> to vector<2x32xbf16>
    %cst_25 = arith.constant dense<0.000000e+00> : vector<2x32xf32>
    %41 = tpu.matmul %40, %39, %cst_25 {dimension_numbers = #tpu.dot_dimension_numbers<[1], [0], [0], [1], [0, 0, 1, 1], [], []>} : vector<2x32xbf16>, vector<32x32xbf16>, vector<2x32xf32> -> vector<2x32xf32>
    %42 = arith.addf %32, %41 : vector<2x32xf32>
    %c0_26 = arith.constant 0 : index
    %c0_27 = arith.constant 0 : index
    %43 = vector.load %arg10[%c0_26, %c0_27] : memref<2x32xf32, #tpu.memory_space<vmem>>, vector<2x32xf32>
    tpu.vector_store %arg10[%c0_26, %c0_27], %42 {strides = array<i32>} : memref<2x32xf32, #tpu.memory_space<vmem>>, vector<2x32xf32>,
    %c0_28 = arith.constant 0 : index
    %c0_29 = arith.constant 0 : index
    %44 = vector.load %arg2[%c0_28, %c0_29] : memref<2x32xf32, #tpu.memory_space<vmem>>, vector<2x32xf32>
    %45 = arith.addf %42, %44 : vector<2x32xf32>
    %c0_30 = arith.constant 0 : index
    %c0_31 = arith.constant 0 : index
    %46 = vector.load %arg11[%c0_30, %c0_31] : memref<2x32xf32, #tpu.memory_space<vmem>>, vector<2x32xf32>
    tpu.vector_store %arg11[%c0_30, %c0_31], %45 {strides = array<i32>} : memref<2x32xf32, #tpu.memory_space<vmem>>, vector<2x32xf32>,
    return
  }
}

module attributes {stable_mosaic.version = 11 : i64} {
  func.func @_stage_tail_kernel(%arg0: memref<2x32xf32, #tpu.memory_space<vmem>>, %arg1: memref<2x32xf32, #tpu.memory_space<vmem>>, %arg2: memref<2x32xf32, #tpu.memory_space<vmem>>, %arg3: memref<32x32xbf16, #tpu.memory_space<vmem>>, %arg4: memref<32x32xbf16, #tpu.memory_space<vmem>>, %arg5: memref<1x32xf32, #tpu.memory_space<vmem>>, %arg6: memref<32x32xbf16, #tpu.memory_space<vmem>>, %arg7: memref<1x32xf32, #tpu.memory_space<vmem>>, %arg8: memref<32x32xbf16, #tpu.memory_space<vmem>>, %arg9: memref<32x32xbf16, #tpu.memory_space<vmem>>, %arg10: memref<1x32xf32, #tpu.memory_space<vmem>>, %arg11: memref<32x128xbf16, #tpu.memory_space<vmem>>, %arg12: memref<1x128xf32, #tpu.memory_space<vmem>>, %arg13: memref<2x128xf32, #tpu.memory_space<vmem>>) attributes {dimension_semantics = [], scalar_prefetch = 0 : i64, scratch_operands = 0 : i64, tpu.core_type = #tpu.core_type<tc>} {
    %c0 = arith.constant 0 : index
    %c0_0 = arith.constant 0 : index
    %0 = vector.load %arg1[%c0, %c0_0] : memref<2x32xf32, #tpu.memory_space<vmem>>, vector<2x32xf32>
    %c0_1 = arith.constant 0 : index
    %c0_2 = arith.constant 0 : index
    %1 = vector.load %arg3[%c0_1, %c0_2] : memref<32x32xbf16, #tpu.memory_space<vmem>>, vector<32x32xbf16>
    %2 = arith.truncf %0 : vector<2x32xf32> to vector<2x32xbf16>
    %cst = arith.constant dense<0.000000e+00> : vector<2x32xf32>
    %3 = tpu.matmul %2, %1, %cst {dimension_numbers = #tpu.dot_dimension_numbers<[1], [0], [0], [1], [0, 0, 1, 1], [], []>} : vector<2x32xbf16>, vector<32x32xbf16>, vector<2x32xf32> -> vector<2x32xf32>
    %c0_3 = arith.constant 0 : index
    %c0_4 = arith.constant 0 : index
    %4 = vector.load %arg2[%c0_3, %c0_4] : memref<2x32xf32, #tpu.memory_space<vmem>>, vector<2x32xf32>
    %c0_5 = arith.constant 0 : index
    %c0_6 = arith.constant 0 : index
    %5 = vector.load %arg4[%c0_5, %c0_6] : memref<32x32xbf16, #tpu.memory_space<vmem>>, vector<32x32xbf16>
    %6 = arith.truncf %4 : vector<2x32xf32> to vector<2x32xbf16>
    %cst_7 = arith.constant dense<0.000000e+00> : vector<2x32xf32>
    %7 = tpu.matmul %6, %5, %cst_7 {dimension_numbers = #tpu.dot_dimension_numbers<[1], [0], [0], [1], [0, 0, 1, 1], [], []>} : vector<2x32xbf16>, vector<32x32xbf16>, vector<2x32xf32> -> vector<2x32xf32>
    %8 = arith.addf %3, %7 : vector<2x32xf32>
    %c0_8 = arith.constant 0 : index
    %c0_9 = arith.constant 0 : index
    %9 = vector.load %arg5[%c0_8, %c0_9] : memref<1x32xf32, #tpu.memory_space<vmem>>, vector<1x32xf32>
    %10 = vector.broadcast %9 : vector<1x32xf32> to vector<2x32xf32>
    %11 = arith.addf %8, %10 : vector<2x32xf32>
    %cst_10 = arith.constant 0.000000e+00 : f32
    %12 = vector.broadcast %cst_10 : f32 to vector<2x32xf32>
    %13 = arith.cmpf ogt, %11, %12 : vector<2x32xf32>
    %14 = math.exp %11 : vector<2x32xf32>
    %cst_11 = arith.constant 1.000000e+00 : f32
    %15 = vector.broadcast %cst_11 : f32 to vector<2x32xf32>
    %16 = arith.subf %14, %15 : vector<2x32xf32>
    %17 = arith.select %13, %11, %16 : vector<2x32xi1>, vector<2x32xf32>
    %c0_12 = arith.constant 0 : index
    %c0_13 = arith.constant 0 : index
    %18 = vector.load %arg6[%c0_12, %c0_13] : memref<32x32xbf16, #tpu.memory_space<vmem>>, vector<32x32xbf16>
    %19 = arith.truncf %17 : vector<2x32xf32> to vector<2x32xbf16>
    %cst_14 = arith.constant dense<0.000000e+00> : vector<2x32xf32>
    %20 = tpu.matmul %19, %18, %cst_14 {dimension_numbers = #tpu.dot_dimension_numbers<[1], [0], [0], [1], [0, 0, 1, 1], [], []>} : vector<2x32xbf16>, vector<32x32xbf16>, vector<2x32xf32> -> vector<2x32xf32>
    %c0_15 = arith.constant 0 : index
    %c0_16 = arith.constant 0 : index
    %21 = vector.load %arg7[%c0_15, %c0_16] : memref<1x32xf32, #tpu.memory_space<vmem>>, vector<1x32xf32>
    %22 = vector.broadcast %21 : vector<1x32xf32> to vector<2x32xf32>
    %23 = arith.addf %20, %22 : vector<2x32xf32>
    %c0_17 = arith.constant 0 : index
    %c0_18 = arith.constant 0 : index
    %24 = vector.load %arg0[%c0_17, %c0_18] : memref<2x32xf32, #tpu.memory_space<vmem>>, vector<2x32xf32>
    %c0_19 = arith.constant 0 : index
    %c0_20 = arith.constant 0 : index
    %25 = vector.load %arg10[%c0_19, %c0_20] : memref<1x32xf32, #tpu.memory_space<vmem>>, vector<1x32xf32>
    %26 = vector.broadcast %25 : vector<1x32xf32> to vector<2x32xf32>
    %27 = arith.addf %24, %26 : vector<2x32xf32>
    %cst_21 = arith.constant 0.000000e+00 : f32
    %28 = vector.broadcast %cst_21 : f32 to vector<2x32xf32>
    %29 = arith.cmpf ogt, %24, %28 : vector<2x32xf32>
    %30 = math.exp %24 : vector<2x32xf32>
    %cst_22 = arith.constant 1.000000e+00 : f32
    %31 = vector.broadcast %cst_22 : f32 to vector<2x32xf32>
    %32 = arith.subf %30, %31 : vector<2x32xf32>
    %33 = arith.select %29, %24, %32 : vector<2x32xi1>, vector<2x32xf32>
    %c0_23 = arith.constant 0 : index
    %c0_24 = arith.constant 0 : index
    %34 = vector.load %arg8[%c0_23, %c0_24] : memref<32x32xbf16, #tpu.memory_space<vmem>>, vector<32x32xbf16>
    %35 = arith.truncf %33 : vector<2x32xf32> to vector<2x32xbf16>
    %cst_25 = arith.constant dense<0.000000e+00> : vector<2x32xf32>
    %36 = tpu.matmul %35, %34, %cst_25 {dimension_numbers = #tpu.dot_dimension_numbers<[1], [0], [0], [1], [0, 0, 1, 1], [], []>} : vector<2x32xbf16>, vector<32x32xbf16>, vector<2x32xf32> -> vector<2x32xf32>
    %37 = arith.addf %27, %36 : vector<2x32xf32>
    %cst_26 = arith.constant 0.000000e+00 : f32
    %38 = vector.broadcast %cst_26 : f32 to vector<2x32xf32>
    %39 = arith.cmpf ogt, %23, %38 : vector<2x32xf32>
    %40 = math.exp %23 : vector<2x32xf32>
    %cst_27 = arith.constant 1.000000e+00 : f32
    %41 = vector.broadcast %cst_27 : f32 to vector<2x32xf32>
    %42 = arith.subf %40, %41 : vector<2x32xf32>
    %43 = arith.select %39, %23, %42 : vector<2x32xi1>, vector<2x32xf32>
    %c0_28 = arith.constant 0 : index
    %c0_29 = arith.constant 0 : index
    %44 = vector.load %arg9[%c0_28, %c0_29] : memref<32x32xbf16, #tpu.memory_space<vmem>>, vector<32x32xbf16>
    %45 = arith.truncf %43 : vector<2x32xf32> to vector<2x32xbf16>
    %cst_30 = arith.constant dense<0.000000e+00> : vector<2x32xf32>
    %46 = tpu.matmul %45, %44, %cst_30 {dimension_numbers = #tpu.dot_dimension_numbers<[1], [0], [0], [1], [0, 0, 1, 1], [], []>} : vector<2x32xbf16>, vector<32x32xbf16>, vector<2x32xf32> -> vector<2x32xf32>
    %47 = arith.addf %37, %46 : vector<2x32xf32>
    %c0_31 = arith.constant 0 : index
    %c0_32 = arith.constant 0 : index
    %48 = vector.load %arg11[%c0_31, %c0_32] : memref<32x128xbf16, #tpu.memory_space<vmem>>, vector<32x128xbf16>
    %49 = arith.truncf %47 : vector<2x32xf32> to vector<2x32xbf16>
    %cst_33 = arith.constant dense<0.000000e+00> : vector<2x128xf32>
    %50 = tpu.matmul %49, %48, %cst_33 {dimension_numbers = #tpu.dot_dimension_numbers<[1], [0], [0], [1], [0, 0, 1, 1], [], []>} : vector<2x32xbf16>, vector<32x128xbf16>, vector<2x128xf32> -> vector<2x128xf32>
    %c0_34 = arith.constant 0 : index
    %c0_35 = arith.constant 0 : index
    %51 = vector.load %arg12[%c0_34, %c0_35] : memref<1x128xf32, #tpu.memory_space<vmem>>, vector<1x128xf32>
    %52 = vector.broadcast %51 : vector<1x128xf32> to vector<2x128xf32>
    %53 = arith.addf %50, %52 : vector<2x128xf32>
    %c0_36 = arith.constant 0 : index
    %c0_37 = arith.constant 0 : index
    %54 = vector.load %arg13[%c0_36, %c0_37] : memref<2x128xf32, #tpu.memory_space<vmem>>, vector<2x128xf32>
    tpu.vector_store %arg13[%c0_36, %c0_37], %53 {strides = array<i32>} : memref<2x128xf32, #tpu.memory_space<vmem>>, vector<2x128xf32>,
    return
  }
}

module attributes {stable_mosaic.version = 11 : i64} {
  func.func @_conv_pre_kernel(%arg0: memref<8x32xf32, #tpu.memory_space<vmem>>, %arg1: memref<32x32xbf16, #tpu.memory_space<vmem>>, %arg2: memref<1x32xf32, #tpu.memory_space<vmem>>, %arg3: memref<8x32xf32, #tpu.memory_space<vmem>>) attributes {dimension_semantics = [], scalar_prefetch = 0 : i64, scratch_operands = 0 : i64, tpu.core_type = #tpu.core_type<tc>} {
    %c0 = arith.constant 0 : index
    %c0_0 = arith.constant 0 : index
    %0 = vector.load %arg0[%c0, %c0_0] : memref<8x32xf32, #tpu.memory_space<vmem>>, vector<8x32xf32>
    %cst = arith.constant 0.000000e+00 : f32
    %1 = vector.broadcast %cst : f32 to vector<8x32xf32>
    %2 = arith.cmpf ogt, %0, %1 : vector<8x32xf32>
    %3 = math.exp %0 : vector<8x32xf32>
    %cst_1 = arith.constant 1.000000e+00 : f32
    %4 = vector.broadcast %cst_1 : f32 to vector<8x32xf32>
    %5 = arith.subf %3, %4 : vector<8x32xf32>
    %6 = arith.select %2, %0, %5 : vector<8x32xi1>, vector<8x32xf32>
    %c0_2 = arith.constant 0 : index
    %c0_3 = arith.constant 0 : index
    %7 = vector.load %arg1[%c0_2, %c0_3] : memref<32x32xbf16, #tpu.memory_space<vmem>>, vector<32x32xbf16>
    %8 = arith.truncf %6 : vector<8x32xf32> to vector<8x32xbf16>
    %cst_4 = arith.constant dense<0.000000e+00> : vector<8x32xf32>
    %9 = tpu.matmul %8, %7, %cst_4 {dimension_numbers = #tpu.dot_dimension_numbers<[1], [0], [0], [1], [0, 0, 1, 1], [], []>} : vector<8x32xbf16>, vector<32x32xbf16>, vector<8x32xf32> -> vector<8x32xf32>
    %c0_5 = arith.constant 0 : index
    %c0_6 = arith.constant 0 : index
    %10 = vector.load %arg2[%c0_5, %c0_6] : memref<1x32xf32, #tpu.memory_space<vmem>>, vector<1x32xf32>
    %11 = vector.broadcast %10 : vector<1x32xf32> to vector<8x32xf32>
    %12 = arith.addf %9, %11 : vector<8x32xf32>
    %c0_7 = arith.constant 0 : index
    %c0_8 = arith.constant 0 : index
    %13 = vector.load %arg3[%c0_7, %c0_8] : memref<8x32xf32, #tpu.memory_space<vmem>>, vector<8x32xf32>
    tpu.vector_store %arg3[%c0_7, %c0_8], %12 {strides = array<i32>} : memref<8x32xf32, #tpu.memory_space<vmem>>, vector<8x32xf32>,
    return
  }
}

module attributes {stable_mosaic.version = 11 : i64} {
  func.func @_res_conv_kernel(%arg0: memref<8x288xf32, #tpu.memory_space<vmem>>, %arg1: memref<8x288xf32, #tpu.memory_space<vmem>>, %arg2: memref<288x32xbf16, #tpu.memory_space<vmem>>, %arg3: memref<288x32xbf16, #tpu.memory_space<vmem>>, %arg4: memref<1x32xf32, #tpu.memory_space<vmem>>, %arg5: memref<8x32xf32, #tpu.memory_space<vmem>>, %arg6: memref<8x32xf32, #tpu.memory_space<vmem>>) attributes {dimension_semantics = [], scalar_prefetch = 0 : i64, scratch_operands = 0 : i64, tpu.core_type = #tpu.core_type<tc>} {
    %c0 = arith.constant 0 : index
    %c0_0 = arith.constant 0 : index
    %0 = vector.load %arg5[%c0, %c0_0] : memref<8x32xf32, #tpu.memory_space<vmem>>, vector<8x32xf32>
    %c0_1 = arith.constant 0 : index
    %c0_2 = arith.constant 0 : index
    %1 = vector.load %arg4[%c0_1, %c0_2] : memref<1x32xf32, #tpu.memory_space<vmem>>, vector<1x32xf32>
    %2 = vector.broadcast %1 : vector<1x32xf32> to vector<8x32xf32>
    %3 = arith.addf %0, %2 : vector<8x32xf32>
    %c0_3 = arith.constant 0 : index
    %c0_4 = arith.constant 0 : index
    %4 = vector.load %arg0[%c0_3, %c0_4] : memref<8x288xf32, #tpu.memory_space<vmem>>, vector<8x288xf32>
    %cst = arith.constant 0.000000e+00 : f32
    %5 = vector.broadcast %cst : f32 to vector<8x288xf32>
    %6 = arith.cmpf ogt, %4, %5 : vector<8x288xf32>
    %7 = math.exp %4 : vector<8x288xf32>
    %cst_5 = arith.constant 1.000000e+00 : f32
    %8 = vector.broadcast %cst_5 : f32 to vector<8x288xf32>
    %9 = arith.subf %7, %8 : vector<8x288xf32>
    %10 = arith.select %6, %4, %9 : vector<8x288xi1>, vector<8x288xf32>
    %c0_6 = arith.constant 0 : index
    %c0_7 = arith.constant 0 : index
    %11 = vector.load %arg2[%c0_6, %c0_7] : memref<288x32xbf16, #tpu.memory_space<vmem>>, vector<288x32xbf16>
    %12 = arith.truncf %10 : vector<8x288xf32> to vector<8x288xbf16>
    %cst_8 = arith.constant dense<0.000000e+00> : vector<8x32xf32>
    %13 = tpu.matmul %12, %11, %cst_8 {dimension_numbers = #tpu.dot_dimension_numbers<[1], [0], [0], [1], [0, 0, 1, 1], [], []>} : vector<8x288xbf16>, vector<288x32xbf16>, vector<8x32xf32> -> vector<8x32xf32>
    %14 = arith.addf %3, %13 : vector<8x32xf32>
    %c0_9 = arith.constant 0 : index
    %c0_10 = arith.constant 0 : index
    %15 = vector.load %arg1[%c0_9, %c0_10] : memref<8x288xf32, #tpu.memory_space<vmem>>, vector<8x288xf32>
    %cst_11 = arith.constant 0.000000e+00 : f32
    %16 = vector.broadcast %cst_11 : f32 to vector<8x288xf32>
    %17 = arith.cmpf ogt, %15, %16 : vector<8x288xf32>
    %18 = math.exp %15 : vector<8x288xf32>
    %cst_12 = arith.constant 1.000000e+00 : f32
    %19 = vector.broadcast %cst_12 : f32 to vector<8x288xf32>
    %20 = arith.subf %18, %19 : vector<8x288xf32>
    %21 = arith.select %17, %15, %20 : vector<8x288xi1>, vector<8x288xf32>
    %c0_13 = arith.constant 0 : index
    %c0_14 = arith.constant 0 : index
    %22 = vector.load %arg3[%c0_13, %c0_14] : memref<288x32xbf16, #tpu.memory_space<vmem>>, vector<288x32xbf16>
    %23 = arith.truncf %21 : vector<8x288xf32> to vector<8x288xbf16>
    %cst_15 = arith.constant dense<0.000000e+00> : vector<8x32xf32>
    %24 = tpu.matmul %23, %22, %cst_15 {dimension_numbers = #tpu.dot_dimension_numbers<[1], [0], [0], [1], [0, 0, 1, 1], [], []>} : vector<8x288xbf16>, vector<288x32xbf16>, vector<8x32xf32> -> vector<8x32xf32>
    %25 = arith.addf %14, %24 : vector<8x32xf32>
    %c0_16 = arith.constant 0 : index
    %c0_17 = arith.constant 0 : index
    %26 = vector.load %arg6[%c0_16, %c0_17] : memref<8x32xf32, #tpu.memory_space<vmem>>, vector<8x32xf32>
    tpu.vector_store %arg6[%c0_16, %c0_17], %25 {strides = array<i32>} : memref<8x32xf32, #tpu.memory_space<vmem>>, vector<8x32xf32>,
    return
  }
}

</mosaic_0001>

<bundles_post_ra>
// kernel: _lambda_.6
= control target key start
LH: loop header
LB: loop body
LE: loop exit
PB: predicated region body
PF: predicated region fallthrough
CT: control target
= control target key end

     0   :  { %v116_v0 = vmov 0.0   ;;  %vm117_vm0 = vmmov 0   ;;  %vm45_vm2 = vcmask 261120   ;;  %s153_s1 = inlined_call_operand.vmem [shape: bf16[32,32], index: 1, kind: input, shape index: {}]   ;;  %s154_s0 = inlined_call_operand.vmem [shape: f32[8,32], index: 0, kind: input, shape index: {}]   ;;  %s155_s2 = inlined_call_operand.vmem [shape: f32[1,32], index: 2, kind: input, shape index: {}]   ;;  %s156_s3 = inlined_call_operand.vmem [shape: f32[8,32], index: 3, kind: output, shape index: {}]  }
   0x1   :  { %102 = vmatprep.subr.bf16.mxu0 %v116_v0  ;;  %v112_v1 = vld [vmem:[%s153_s1 + $0x8] sm:$0xff]   ;;  %106 = vmatprep.mubr.msk.bf16.mxu0 %vm117_vm0, %v116_v0  ;;  %v113_v2 = vld [vmem:[%s153_s1] sm:$0xff]  }
   0x2   :  { %103 = vmatpush3.bf16.msra.mxu0 %v112_v1  ;;  %v15_v3 = vld [vmem:[%s154_s0] sm:$0xff] }
   0x3   :  { %104 = vmatprep.subr.bf16.mxu0 %v116_v0  ;;  %v17_v4 = vmul.f32 1.442695, %v15_v3  ;;  %vm16_vm1 = vcmp.gt.f32.partialorder %v15_v3, 0.0  ;;  %v95_v9 = vld [vmem:[%s155_s2] ss:$0 sm:$0xff] }
   0x5   :  { %114 = vpow2.f32 %v17_v4 }
   0x6   :  { %105 = vmatpush3.bf16.msra.mxu0 %v113_v2 }
  0x12   :  { %v115_v5 = vpop.eup %114 }
  0x13   :  { %v94_v6 = vadd.f32 -1.0, %v115_v5 }
  0x15   :  { %v20_v7 = vsel %vm16_vm1, %v15_v3, %v94_v6 }
  0x16   :  { %v25_v8 = vpack.c.bf16 %v20_v7, %v20_v7 }
  0x18   :  { %107 = vmatmul.mubr.msk.bf16.vlgmr.msra.gmra.mxu0 %vm45_vm2, %v25_v8 }
  0xd8   :  { %v83_v10 = vpop.f32.mrf.mxu0 }
  0xd9   :  { %v84_v11 = vadd.f32 %v95_v9, %v83_v10 }
  0xda   :  { %v108_v12 = vpop.f32.mrf.mxu0 }
  0xdb   :  { %89 = vst.msk [vmem:[%s156_s3] sm:$0xff] %vm45_vm2, %v84_v11 }
  0xdc   :  { %v86_v13 = vpop.f32.mrf.mxu0 }
  0xde   :  { %v109_v14 = vpop.f32.mrf.mxu0 }

// kernel: _lambda_.4
= control target key start
LH: loop header
LB: loop body
LE: loop exit
PB: predicated region body
PF: predicated region fallthrough
CT: control target
= control target key end

     0   :  { %17 = vsyncpa [#allocation3], 0  ;;  %s603_s0 = inlined_call_operand.hbm [shape: f32[2,32], index: 0, kind: input, shape index: {}]   ;;  %s604_s1 = inlined_call_operand.hbm [shape: f32[2,32], index: 1, kind: input, shape index: {}]   ;;  %s605_s2 = inlined_call_operand.vmem [shape: f32[2,32], index: 2, kind: input, shape index: {}]   ;;  %s606_s3 = inlined_call_operand.vmem [shape: bf16[32,32], index: 3, kind: input, shape index: {}]   ;;  %s607_s4 = inlined_call_operand.vmem [shape: f32[1,32], index: 4, kind: input, shape index: {}]   ;;  %s608_s5 = inlined_call_operand.vmem [shape: bf16[32,32], index: 5, kind: input, shape index: {}]   ;;  %s609_s6 = inlined_call_operand.vmem [shape: f32[1,32], index: 6, kind: input, shape index: {}]   ;;  %s610_s7 = inlined_call_operand.vmem [shape: bf16[32,32], index: 7, kind: input, shape index: {}]   ;;  %s611_s8 = inlined_call_operand.vmem [shape: bf16[32,32], index: 8, kind: input, shape index: {}]   ;;  %s612_s9 = inlined_call_operand.vmem [shape: f32[1,32], index: 9, kind: input, shape index: {}]   ;;  %s613_s10 = inlined_call_operand.vmem [shape: f32[2,32], index: 10, kind: output, shape index: {0}]   ;;  %s614_s11 = inlined_call_operand.vmem [shape: f32[2,32], index: 11, kind: output, shape index: {1}]  }
   0x1   :  { %18 = vsyncpa [#allocation5], 0  ;;  %s483_s17 = smov [#allocation2]   ;;  %s484_s19 = smov [#allocation4]  }
   0x2   :  { %s25_s18 = sshll.u32 %s483_s17, 4  ;;  %s35_s20 = sshll.u32 %s484_s19, 4  ;;  %s26_s18 = int_to_ptr.vmem [resolvable:$true] %s25_s18  ;;  %s36_s20 = int_to_ptr.vmem [resolvable:$true] %s35_s20 }
   0x3   :  { %s447_s21 = scalar_lea.vmem %s26_s18, 32  ;;  %p452_p1 = scmp.lt.s32.totalorder %s26_s18, %s26_s18 }
   0x4   :  { %p448_p0 = scmp.ne.s32.totalorder %s26_s18, %s447_s21  ;;  %p453_p2 = scmp.lt.s32.totalorder %s447_s21, %s447_s21 }
   0x6   :  { %p454_p3 = por %p453_p2, %p452_p1 }
   0x8   :  { %p455_p4 = pnand %p454_p3, %p448_p0 }
   0xa   :  { %458 = shalt.err (!%p455_p4)
}
   0xb   :  { %28 = dma.hbm_to_vmem [thread:$0]  %s603_s0, 32, %s26_s18, [#allocation3]  }
   0xc   :  { %s467_s24 = scalar_lea.vmem %s36_s20, 32  ;;  %p472_p6 = scmp.lt.s32.totalorder %s36_s20, %s36_s20 }
   0xd   :  { %p468_p5 = scmp.ne.s32.totalorder %s36_s20, %s467_s24  ;;  %p473_p7 = scmp.lt.s32.totalorder %s467_s24, %s467_s24 }
   0xf   :  { %p474_p8 = por %p473_p7, %p472_p6 }
  0x11   :  { %p475_p9 = pnand %p474_p8, %p468_p5 }
  0x13   :  { %478 = shalt.err (!%p475_p9)
}
  0x14   :  { %38 = dma.hbm_to_vmem [thread:$0]  %s604_s1, 32, %s36_s20, [#allocation5]  }
  0x15   :  { %479 = dma.done.wait [#allocation3], 32  }
  0x16   :  { %480 = vsyncadd [#allocation3], 4294967264 }
  0x17   :  { %481 = dma.done.wait [#allocation5], 32  }
  0x18   :  { %482 = vsyncadd [#allocation5], 4294967264  ;;  %v485_v0 = vmov 0.0   ;;  %vm486_vm0 = vmmov 0   ;;  %v425_v1 = vld [vmem:[%s606_s3 + $0x8] sm:$0xff]   ;;  %v426_v2 = vld [vmem:[%s606_s3] sm:$0xff]  }
  0x19   :  { %389 = vmatprep.subr.bf16.mxu0 %v485_v0  ;;  %393 = vmatprep.mubr.msk.bf16.mxu0 %vm486_vm0, %v485_v0  ;;  %v62_v3 = vld [vmem:[#allocation2] sm:$0x3]  ;;  %v427_v4 = vld [vmem:[%s608_s5 + $0x8] sm:$0xff]   ;;  %v131_v5 = vld [vmem:[#allocation4] sm:$0x3]  ;;  %vm87_vm1 = vcmask 261120  }
  0x1a   :  { %397 = vmatprep.subr.bf16.mxu1 %v485_v0  ;;  %401 = vmatprep.mubr.msk.bf16.mxu1 %vm486_vm0, %v485_v0  ;;  %v67_v6 = vpack.c.bf16 %v62_v3, %v62_v3  ;;  %v428_v7 = vld [vmem:[%s608_s5] sm:$0xff]   ;;  %v133_v8 = vmul.f32 1.442695, %v131_v5  ;;  %vm132_vm2 = vcmp.gt.f32.partialorder %v131_v5, 0.0  ;;  %v429_v13 = vld [vmem:[%s610_s7 + $0x8] sm:$0xff]   ;;  %vm344_vm5 = vcmask 254976  }
  0x1b   :  { %390 = vmatpush3.bf16.msra.mxu0 %v425_v1  ;;  %398 = vmatpush3.bf16.msra.mxu1 %v427_v4  ;;  %v430_v14 = vld [vmem:[%s610_s7] sm:$0xff]   ;;  %v431_v15 = vld [vmem:[%s611_s8 + $0x8] sm:$0xff]  }
  0x1c   :  { %391 = vmatprep.subr.bf16.mxu0 %v485_v0  ;;  %399 = vmatprep.subr.bf16.mxu1 %v485_v0  ;;  %433 = vpow2.f32 %v133_v8  ;;  %v432_v16 = vld [vmem:[%s611_s8] sm:$0xff]  }
  0x1d   :  { %v359_v17 = vld [vmem:[%s607_s4] ss:$0 sm:$0xff] }
  0x1e   :  { %v364_v24 = vld [vmem:[%s609_s6] ss:$0 sm:$0xff] }
  0x1f   :  { %392 = vmatpush3.bf16.msra.mxu0 %v426_v2  ;;  %400 = vmatpush3.bf16.msra.mxu1 %v428_v7  ;;  %v368_v43 = vld [vmem:[%s612_s9] ss:$0 sm:$0xff] }
  0x20   :  { %405 = vmatprep.subr.bf16.mxu0 %v485_v0  ;;  %413 = vmatprep.subr.bf16.mxu1 %v485_v0  ;;  %v346_v47 = vld [vmem:[%s605_s2] sm:$0x3] }
  0x22   :  { %394 = vmatmul.mubr.msk.bf16.vlgmr.msra.gmra.mxu0 %vm87_vm1, %v67_v6 }
  0x23   :  { %409 = vmatprep.mubr.msk.bf16.mxu0 %vm486_vm0, %v485_v0  ;;  %406 = vmatpush3.bf16.msra.mxu0 %v429_v13 }
  0x24   :  { %407 = vmatprep.subr.bf16.mxu0 %v485_v0 }
  0x27   :  { %408 = vmatpush3.bf16.msra.mxu0 %v430_v14 }
  0x29   :  { %v434_v9 = vpop.eup %433 }
  0x2a   :  { %v363_v10 = vadd.f32 -1.0, %v434_v9 }
  0x2c   :  { %v136_v11 = vsel %vm132_vm2, %v131_v5, %v363_v10 }
  0x2d   :  { %v141_v12 = vpack.c.bf16 %v136_v11, %v136_v11 }
  0x2f   :  { %402 = vmatmul.mubr.msk.bf16.vlgmr.msra.gmra.mxu1 %vm87_vm1, %v141_v12 }
  0x30   :  { %417 = vmatprep.mubr.msk.bf16.mxu1 %vm486_vm0, %v485_v0  ;;  %414 = vmatpush3.bf16.msra.mxu1 %v431_v15 }
  0x31   :  { %415 = vmatprep.subr.bf16.mxu1 %v485_v0 }
  0x34   :  { %416 = vmatpush3.bf16.msra.mxu1 %v432_v16 }
  0xe2   :  { %v125_v18 = vpop.f32.mrf.mxu0 }
  0xe3   :  { %v126_v19 = vadd.f32 %v359_v17, %v125_v18 }
  0xe4   :  { %v395_v20 = vpop.f32.mrf.mxu0 }
  0xe5   :  { %v213_v21 = vmul.f32 1.442695, %v126_v19  ;;  %vm212_vm3 = vcmp.gt.f32.partialorder %v126_v19, 0.0  ;;  %v211_v44 = vadd.f32 %v368_v43, %v126_v19 }
  0xe6   :  { %v128_v22 = vpop.f32.mrf.mxu0 }
  0xe7   :  { %435 = vpow2.f32 %v213_v21 }
  0xe8   :  { %v396_v23 = vpop.f32.mrf.mxu0 }
  0xef   :  { %v198_v25 = vpop.f32.mrf.mxu1 }
  0xf0   :  { %v199_v27 = vadd.f32 %v364_v24, %v198_v25 }
  0xf1   :  { %v403_v29 = vpop.f32.mrf.mxu1 }
  0xf2   :  { %v279_v30 = vmul.f32 1.442695, %v199_v27  ;;  %vm278_vm4 = vcmp.gt.f32.partialorder %v199_v27, 0.0 }
  0xf3   :  { %v201_v32 = vpop.f32.mrf.mxu1 }
  0xf4   :  { %v436_v26 = vpop.eup %435  ;;  %437 = vpow2.f32 %v279_v30 }
  0xf5   :  { %v369_v28 = vadd.f32 -1.0, %v436_v26  ;;  %v404_v34 = vpop.f32.mrf.mxu1 }
  0xf7   :  { %v216_v31 = vsel %vm212_vm3, %v126_v19, %v369_v28 }
  0xf8   :  { %v221_v33 = vpack.c.bf16 %v216_v31, %v216_v31 }
  0xfa   :  { %410 = vmatmul.mubr.msk.bf16.vlgmr.msra.gmra.mxu0 %vm87_vm1, %v221_v33 }
 0x101   :  { %v438_v35 = vpop.eup %437 }
 0x102   :  { %v373_v36 = vadd.f32 -1.0, %v438_v35 }
 0x104   :  { %v282_v37 = vsel %vm278_vm4, %v199_v27, %v373_v36 }
 0x105   :  { %v287_v38 = vpack.c.bf16 %v282_v37, %v282_v37 }
 0x107   :  { %418 = vmatmul.mubr.msk.bf16.vlgmr.msra.gmra.mxu1 %vm87_vm1, %v287_v38 }
 0x1ba   :  { %v271_v39 = vpop.f32.mrf.mxu0 }
 0x1bb   :  { %v277_v45 = vadd.f32 %v271_v39, %v211_v44 }
 0x1bc   :  { %v411_v40 = vpop.f32.mrf.mxu0 }
 0x1be   :  { %v274_v41 = vpop.f32.mrf.mxu0 }
 0x1c0   :  { %v412_v42 = vpop.f32.mrf.mxu0 }
 0x1c7   :  { %v337_v46 = vpop.f32.mrf.mxu1 }
 0x1c8   :  { %v343_v48 = vadd.f32 %v337_v46, %v277_v45 }
 0x1c9   :  { %v419_v49 = vpop.f32.mrf.mxu1 }
 0x1ca   :  { %345 = vst.msk [vmem:[%s613_s10] sm:$0x3] %vm344_vm5, %v343_v48  ;;  %v347_v50 = vadd.f32 %v346_v47, %v343_v48 }
 0x1cb   :  { %v340_v51 = vpop.f32.mrf.mxu1 }
 0x1cc   :  { %348 = vst.msk [vmem:[%s614_s11] sm:$0x3] %vm344_vm5, %v347_v50 }
 0x1cd   :  { %v420_v52 = vpop.f32.mrf.mxu1 }
 0x1ce   :  { %357 = vsyncpa [#allocation3], 1 }
 0x1cf   :  { %358 = vsyncpa [#allocation5], 1 }

// kernel: _lambda_.5
= control target key start
LH: loop header
LB: loop body
LE: loop exit
PB: predicated region body
PF: predicated region fallthrough
CT: control target
= control target key end

     0   :  { %18 = vsyncpa [#allocation3], 0  ;;  %s608_s25 = smov [#allocation2]   ;;  %s771_s0 = inlined_call_operand.vmem [shape: f32[2,32], index: 0, kind: input, shape index: {}]   ;;  %s772_s1 = inlined_call_operand.hbm [shape: f32[2,32], index: 1, kind: input, shape index: {}]   ;;  %s773_s2 = inlined_call_operand.vmem [shape: f32[2,32], index: 2, kind: input, shape index: {}]   ;;  %s774_s3 = inlined_call_operand.vmem [shape: bf16[32,32], index: 3, kind: input, shape index: {}]   ;;  %s775_s4 = inlined_call_operand.vmem [shape: bf16[32,32], index: 4, kind: input, shape index: {}]   ;;  %s776_s5 = inlined_call_operand.vmem [shape: f32[1,32], index: 5, kind: input, shape index: {}]   ;;  %s777_s6 = inlined_call_operand.vmem [shape: bf16[32,32], index: 6, kind: input, shape index: {}]   ;;  %s778_s7 = inlined_call_operand.vmem [shape: f32[1,32], index: 7, kind: input, shape index: {}]   ;;  %s779_s8 = inlined_call_operand.vmem [shape: bf16[32,32], index: 8, kind: input, shape index: {}]   ;;  %s780_s9 = inlined_call_operand.vmem [shape: bf16[32,32], index: 9, kind: input, shape index: {}]   ;;  %s781_s10 = inlined_call_operand.vmem [shape: f32[1,32], index: 10, kind: input, shape index: {}]   ;;  %s782_s11 = inlined_call_operand.vmem [shape: bf16[32,128], index: 11, kind: input, shape index: {}]   ;;  %s783_s12 = inlined_call_operand.vmem [shape: f32[1,128], index: 12, kind: input, shape index: {}]   ;;  %s784_s13 = inlined_call_operand.vmem [shape: f32[2,128], index: 13, kind: output, shape index: {}]  }
   0x1   :  { %s27_s26 = sshll.u32 %s608_s25, 4  ;;  %s28_s26 = int_to_ptr.vmem [resolvable:$true] %s27_s26 }
   0x2   :  { %s594_s27 = scalar_lea.vmem %s28_s26, 32  ;;  %p599_p1 = scmp.lt.s32.totalorder %s28_s26, %s28_s26 }
   0x3   :  { %p595_p0 = scmp.ne.s32.totalorder %s28_s26, %s594_s27  ;;  %p600_p2 = scmp.lt.s32.totalorder %s594_s27, %s594_s27 }
   0x5   :  { %p601_p3 = por %p600_p2, %p599_p1 }
   0x7   :  { %p602_p4 = pnand %p601_p3, %p595_p0 }
   0x9   :  { %605 = shalt.err (!%p602_p4)
}
   0xa   :  { %30 = dma.hbm_to_vmem [thread:$0]  %s772_s1, 32, %s28_s26, [#allocation3]  }
   0xb   :  { %606 = dma.done.wait [#allocation3], 32  }
   0xc   :  { %607 = vsyncadd [#allocation3], 4294967264  ;;  %v609_v0 = vmov 0.0   ;;  %vm610_vm0 = vmmov 0   ;;  %v568_v1 = vld [vmem:[%s775_s4 + $0x8] sm:$0xff]   ;;  %v570_v3 = vld [vmem:[%s775_s4] sm:$0xff]  }
   0xd   :  { %517 = vmatprep.subr.bf16.mxu0 %v609_v0  ;;  %525 = vmatprep.subr.bf16.mxu1 %v609_v0  ;;  %v569_v2 = vld [vmem:[%s774_s3 + $0x8] sm:$0xff]   ;;  %v571_v4 = vld [vmem:[%s774_s3] sm:$0xff]   ;;  %vm81_vm1 = vcmask 261120  }
   0xe   :  { %521 = vmatprep.mubr.msk.bf16.mxu0 %vm610_vm0, %v609_v0  ;;  %529 = vmatprep.mubr.msk.bf16.mxu1 %vm610_vm0, %v609_v0  ;;  %v63_v5 = vld [vmem:[%s773_s2] sm:$0x3]  ;;  %v572_v9 = vld [vmem:[%s777_s6 + $0x8] sm:$0xff]  }
   0xf   :  { %518 = vmatpush3.bf16.msra.mxu0 %v568_v1  ;;  %526 = vmatpush3.bf16.msra.mxu1 %v569_v2  ;;  %v57_v6 = vld [vmem:[#allocation2] sm:$0x3]  ;;  %v68_v7 = vpack.c.bf16 %v63_v5, %v63_v5  ;;  %v574_v29 = vld [vmem:[%s779_s8 + $0x8] sm:$0xff]  }
  0x10   :  { %519 = vmatprep.subr.bf16.mxu0 %v609_v0  ;;  %527 = vmatprep.subr.bf16.mxu1 %v609_v0  ;;  %v62_v8 = vpack.c.bf16 %v57_v6, %v57_v6  ;;  %v573_v10 = vld [vmem:[%s777_s6] sm:$0xff]   ;;  %v576_v35 = vld [vmem:[%s780_s9 + $0x8] sm:$0xff]  }
  0x11   :  { %v480_v13 = vld [vmem:[%s776_s5] ss:$0 sm:$0xff]  ;;  %v578_v37 = vld [vmem:[%s782_s11 + $0x8] sm:$0xff]  }
  0x12   :  { %v260_v27 = vld [vmem:[%s771_s0] sm:$0x3] }
  0x13   :  { %520 = vmatpush3.bf16.msra.mxu0 %v570_v3  ;;  %528 = vmatpush3.bf16.msra.mxu1 %v571_v4  ;;  %v270_v28 = vmul.f32 1.442695, %v260_v27  ;;  %v575_v31 = vld [vmem:[%s779_s8] sm:$0xff]   ;;  %vm269_vm3 = vcmp.gt.f32.partialorder %v260_v27, 0.0 }
  0x14   :  { %533 = vmatprep.subr.bf16.mxu0 %v609_v0  ;;  %541 = vmatprep.subr.bf16.mxu1 %v609_v0  ;;  %v577_v36 = vld [vmem:[%s780_s9] sm:$0xff]  }
  0x15   :  { %v482_v38 = vld [vmem:[%s778_s7] ss:$0 sm:$0xff] }
  0x16   :  { %522 = vmatmul.mubr.msk.bf16.vlgmr.msra.gmra.mxu0 %vm81_vm1, %v68_v7  ;;  %530 = vmatmul.mubr.msk.bf16.vlgmr.msra.gmra.mxu1 %vm81_vm1, %v62_v8  ;;  %v486_v49 = vld [vmem:[%s781_s10] ss:$0 sm:$0xff] }
  0x17   :  { %537 = vmatprep.mubr.msk.bf16.mxu0 %vm610_vm0, %v609_v0  ;;  %545 = vmatprep.mubr.msk.bf16.mxu1 %vm610_vm0, %v609_v0  ;;  %v268_v50 = vadd.f32 %v486_v49, %v260_v27  ;;  %v579_v56 = vld [vmem:[%s782_s11] sm:$0xff]  }
  0x18   :  { %534 = vmatpush3.bf16.msra.mxu0 %v572_v9  ;;  %542 = vmatpush3.bf16.msra.mxu1 %v574_v29  ;;  %v495_v63 = vld [vmem:[%s783_s12] ss:$0 sm:$0xff] }
  0x19   :  { %535 = vmatprep.subr.bf16.mxu0 %v609_v0  ;;  %543 = vmatprep.subr.bf16.mxu1 %v609_v0 }
  0x1c   :  { %536 = vmatpush3.bf16.msra.mxu0 %v573_v10  ;;  %544 = vmatpush3.bf16.msra.mxu1 %v575_v31 }
  0x1d   :  { %549 = vmatprep.subr.bf16.mxu0 %v609_v0  ;;  %557 = vmatprep.subr.bf16.mxu1 %v609_v0 }
  0xd6   :  { %v119_v11 = vpop.f32.mrf.mxu0  ;;  %v174_v12 = vpop.f32.mrf.mxu1 }
  0xd7   :  { %v175_v14 = vadd.f32 %v174_v12, %v119_v11 }
  0xd8   :  { %v523_v15 = vpop.f32.mrf.mxu0  ;;  %v531_v16 = vpop.f32.mrf.mxu1 }
  0xd9   :  { %v187_v17 = vadd.f32 %v480_v13, %v175_v14 }
  0xda   :  { %v122_v18 = vpop.f32.mrf.mxu0  ;;  %v177_v19 = vpop.f32.mrf.mxu1 }
  0xdb   :  { %v189_v20 = vmul.f32 1.442695, %v187_v17  ;;  %vm188_vm2 = vcmp.gt.f32.partialorder %v187_v17, 0.0 }
  0xdc   :  { %v524_v21 = vpop.f32.mrf.mxu0  ;;  %v532_v22 = vpop.f32.mrf.mxu1 }
  0xdd   :  { %580 = vpow2.f32 %v189_v20 }
  0xde   :  { %582 = vpow2.f32 %v270_v28 }
  0xea   :  { %v581_v23 = vpop.eup %580 }
  0xeb   :  { %v481_v24 = vadd.f32 -1.0, %v581_v23  ;;  %v583_v30 = vpop.eup %582 }
  0xec   :  { %v487_v32 = vadd.f32 -1.0, %v583_v30 }
  0xed   :  { %v192_v25 = vsel %vm188_vm2, %v187_v17, %v481_v24 }
  0xee   :  { %v197_v26 = vpack.c.bf16 %v192_v25, %v192_v25  ;;  %v273_v33 = vsel %vm269_vm3, %v260_v27, %v487_v32 }
  0xef   :  { %v278_v34 = vpack.c.bf16 %v273_v33, %v273_v33 }
  0xf0   :  { %538 = vmatmul.mubr.msk.bf16.vlgmr.msra.gmra.mxu0 %vm81_vm1, %v197_v26 }
  0xf1   :  { %553 = vmatprep.mubr.msk.bf16.mxu0 %vm610_vm0, %v609_v0  ;;  %546 = vmatmul.mubr.msk.bf16.vlgmr.msra.gmra.mxu1 %vm81_vm1, %v278_v34 }
  0xf2   :  { %550 = vmatpush3.bf16.msra.mxu0 %v576_v35  ;;  %561 = vmatprep.mubr.msk.bf16.mxu1 %vm610_vm0, %v609_v0 }
  0xf3   :  { %551 = vmatprep.subr.bf16.mxu0 %v609_v0  ;;  %558 = vmatpush3.bf16.msra.mxu1 %v578_v37 }
  0xf4   :  { %559 = vmatprep.subr.bf16.mxu1 %v609_v0 }
  0xf6   :  { %552 = vmatpush3.bf16.msra.mxu0 %v577_v36 }
  0xf7   :  { %560 = vmatpush3.bf16.msra.mxu1 %v579_v56 }
 0x1b0   :  { %v254_v39 = vpop.f32.mrf.mxu0 }
 0x1b1   :  { %v255_v40 = vadd.f32 %v482_v38, %v254_v39  ;;  %v328_v51 = vpop.f32.mrf.mxu1 }
 0x1b2   :  { %v539_v41 = vpop.f32.mrf.mxu0  ;;  %v334_v52 = vadd.f32 %v328_v51, %v268_v50 }
 0x1b3   :  { %v336_v42 = vmul.f32 1.442695, %v255_v40  ;;  %vm335_vm4 = vcmp.gt.f32.partialorder %v255_v40, 0.0  ;;  %v547_v53 = vpop.f32.mrf.mxu1 }
 0x1b4   :  { %v257_v43 = vpop.f32.mrf.mxu0 }
 0x1b5   :  { %584 = vpow2.f32 %v336_v42  ;;  %v331_v54 = vpop.f32.mrf.mxu1 }
 0x1b6   :  { %v540_v44 = vpop.f32.mrf.mxu0 }
 0x1b7   :  { %v548_v55 = vpop.f32.mrf.mxu1 }
 0x1c2   :  { %v585_v45 = vpop.eup %584 }
 0x1c3   :  { %v491_v46 = vadd.f32 -1.0, %v585_v45 }
 0x1c5   :  { %v339_v47 = vsel %vm335_vm4, %v255_v40, %v491_v46 }
 0x1c6   :  { %v344_v48 = vpack.c.bf16 %v339_v47, %v339_v47 }
 0x1c8   :  { %554 = vmatmul.mubr.msk.bf16.vlgmr.msra.gmra.mxu0 %vm81_vm1, %v344_v48 }
 0x288   :  { %v394_v57 = vpop.f32.mrf.mxu0 }
 0x289   :  { %v400_v58 = vadd.f32 %v394_v57, %v334_v52 }
 0x28a   :  { %v555_v59 = vpop.f32.mrf.mxu0 }
 0x28b   :  { %v405_v60 = vpack.c.bf16 %v400_v58, %v400_v58 }
 0x28c   :  { %v397_v61 = vpop.f32.mrf.mxu0 }
 0x28d   :  { %562 = vmatmul.mubr.msk.bf16.vlgmr.msra.gmra.mxu1 %vm81_vm1, %v405_v60 }
 0x28e   :  { %v556_v62 = vpop.f32.mrf.mxu0 }
 0x34d   :  { %v462_v0 = vpop.f32.mrf.mxu1 }
 0x34e   :  { %v463_v1 = vadd.f32 %v495_v63, %v462_v0 }
 0x34f   :  { %v563_v2 = vpop.f32.mrf.mxu1 }
 0x350   :  { %468 = vst [vmem:[%s784_s13] sm:$0x3] %v463_v1 }
 0x351   :  { %v465_v3 = vpop.f32.mrf.mxu1 }
 0x353   :  { %v564_v4 = vpop.f32.mrf.mxu1 }
 0x354   :  { %473 = vsyncpa [#allocation3], 1 }

// kernel: _lambda_.7
= control target key start
LH: loop header
LB: loop body
LE: loop exit
PB: predicated region body
PF: predicated region fallthrough
CT: control target
= control target key end

     0   :  { %v698_v1 = vmov 0.0   ;;  %vm699_vm0 = vmmov 0   ;;  %vm198_vm2 = vcmask 261120   ;;  %s881_s2 = inlined_call_operand.vmem [shape: bf16[288,32], index: 2, kind: input, shape index: {}]   ;;  %s882_s3 = inlined_call_operand.vmem [shape: bf16[288,32], index: 3, kind: input, shape index: {}]   ;;  %s883_s0 = inlined_call_operand.vmem [shape: f32[8,288], index: 0, kind: input, shape index: {}]   ;;  %s884_s1 = inlined_call_operand.vmem [shape: f32[8,288], index: 1, kind: input, shape index: {}]   ;;  %s885_s4 = inlined_call_operand.vmem [shape: f32[1,32], index: 4, kind: input, shape index: {}]   ;;  %s886_s5 = inlined_call_operand.vmem [shape: f32[8,32], index: 5, kind: input, shape index: {}]   ;;  %s887_s6 = inlined_call_operand.vmem [shape: f32[8,32], index: 6, kind: output, shape index: {}]  }
   0x1   :  { %v650_v0 = vld [vmem:[%s881_s2 + $0x78] sm:$0xff]   ;;  %632 = vmatprep.subr.bf16.mxu1 %v698_v1  ;;  %636 = vmatprep.mubr.msk.bf16.mxu1 %vm699_vm0, %v698_v1  ;;  %v652_v3 = vld [vmem:[%s881_s2 + $0x70] sm:$0xff]   ;;  %v654_v5 = vld [vmem:[%s881_s2 + $0x68] sm:$0xff]  }
   0x2   :  { %v651_v2 = vld [vmem:[%s881_s2 + $0x38] sm:$0xff]   ;;  %582 = vmatprep.subr.bf16.mxu0 %v650_v0  ;;  %v653_v4 = vld [vmem:[%s881_s2 + $0x30] sm:$0xff]   ;;  %v656_v6 = vld [vmem:[%s881_s2 + $0x88] sm:$0xff]  }
   0x3   :  { %583 = vmatpush3.bf16.msra.mxu0 %v651_v2  ;;  %v655_v7 = vld [vmem:[%s881_s2 + $0x28] sm:$0xff]   ;;  %633 = vmatpush3.bf16.msra.mxu1 %v656_v6  ;;  %v657_v8 = vld [vmem:[%s881_s2 + $0x60] sm:$0xff]   ;;  %v660_v11 = vld [vmem:[%s881_s2 + $0x58] sm:$0xff]  }
   0x4   :  { %584 = vmatprep.subr.bf16.mxu0 %v652_v3  ;;  %634 = vmatprep.subr.bf16.mxu1 %v698_v1  ;;  %v659_v9 = vld [vmem:[%s881_s2 + $0x80] sm:$0xff]   ;;  %v662_v12 = vld [vmem:[%s882_s3 + $0x78] sm:$0xff]   ;;  %v35_v13 = vld [vmem:[%s883_s0 + $0x10] sm:$0xff] }
   0x5   :  { %v658_v10 = vld [vmem:[%s881_s2 + $0x20] sm:$0xff]   ;;  %v43_v14 = vmul.f32 1.442695, %v35_v13  ;;  %v661_v15 = vld [vmem:[%s881_s2 + $0x18] sm:$0xff]   ;;  %v664_v16 = vld [vmem:[%s881_s2 + $0x50] sm:$0xff]   ;;  %vm38_vm1 = vcmp.gt.f32.partialorder %v35_v13, 0.0 }
   0x6   :  { %v665_v17 = vld [vmem:[%s881_s2 + $0x10] sm:$0xff]   ;;  %v668_v18 = vld [vmem:[%s881_s2 + $0x48] sm:$0xff]   ;;  %v672_v20 = vld [vmem:[%s881_s2 + $0x40] sm:$0xff]  }
   0x7   :  { %585 = vmatpush3.bf16.msra.mxu0 %v653_v4  ;;  %635 = vmatpush3.bf16.msra.mxu1 %v659_v9  ;;  %686 = vpow2.f32 %v43_v14  ;;  %v669_v19 = vld [vmem:[%s881_s2 + $0x8] sm:$0xff]   ;;  %v673_v22 = vld [vmem:[%s881_s2] sm:$0xff]   ;;  %v663_v29 = vld [vmem:[%s882_s3 + $0x38] sm:$0xff]  }
   0x8   :  { %586 = vmatprep.subr.bf16.mxu0 %v654_v5  ;;  %607 = vmatprep.subr.bf16.mxu1 %v662_v12  ;;  %v34_v21 = vld [vmem:[%s883_s0 + $0x8] sm:$0xff]  ;;  %v33_v24 = vld [vmem:[%s883_s0] sm:$0xff]  ;;  %v666_v31 = vld [vmem:[%s882_s3 + $0x70] sm:$0xff]  }
   0x9   :  { %v41_v23 = vmul.f32 1.442695, %v34_v21  ;;  %v39_v25 = vmul.f32 1.442695, %v33_v24  ;;  %v667_v32 = vld [vmem:[%s882_s3 + $0x30] sm:$0xff]   ;;  %v670_v33 = vld [vmem:[%s882_s3 + $0x68] sm:$0xff]  }
   0xa   :  { %v285_v34 = vld [vmem:[%s884_s1 + $0x10] sm:$0xff]  ;;  %v284_v35 = vld [vmem:[%s884_s1 + $0x8] sm:$0xff]  ;;  %v283_v36 = vld [vmem:[%s884_s1] sm:$0xff]  ;;  %vm37_vm3 = vcmp.gt.f32.partialorder %v34_v21, 0.0  ;;  %vm36_vm4 = vcmp.gt.f32.partialorder %v33_v24, 0.0 }
   0xb   :  { %587 = vmatpush3.bf16.msra.mxu0 %v655_v7  ;;  %688 = vpow2.f32 %v41_v23  ;;  %v293_v37 = vmul.f32 1.442695, %v285_v34  ;;  %v291_v38 = vmul.f32 1.442695, %v284_v35  ;;  %v671_v39 = vld [vmem:[%s882_s3 + $0x28] sm:$0xff]   ;;  %v674_v42 = vld [vmem:[%s882_s3 + $0x60] sm:$0xff]  }
   0xc   :  { %588 = vmatprep.subr.bf16.mxu0 %v657_v8  ;;  %690 = vpow2.f32 %v39_v25  ;;  %v289_v40 = vmul.f32 1.442695, %v283_v36  ;;  %v675_v46 = vld [vmem:[%s882_s3 + $0x20] sm:$0xff]   ;;  %v676_v49 = vld [vmem:[%s882_s3 + $0x58] sm:$0xff]   ;;  %v680_v51 = vld [vmem:[%s882_s3 + $0x88] sm:$0xff]   ;;  %vm288_vm5 = vcmp.gt.f32.partialorder %v285_v34, 0.0 }
   0xd   :  { %692 = vpow2.f32 %v293_v37  ;;  %v677_v53 = vld [vmem:[%s882_s3 + $0x18] sm:$0xff]   ;;  %v678_v54 = vld [vmem:[%s882_s3 + $0x50] sm:$0xff]   ;;  %v683_v55 = vld [vmem:[%s882_s3 + $0x80] sm:$0xff]   ;;  %vm287_vm6 = vcmp.gt.f32.partialorder %v284_v35, 0.0  ;;  %vm286_vm7 = vcmp.gt.f32.partialorder %v283_v36, 0.0 }
   0xe   :  { %694 = vpow2.f32 %v291_v38  ;;  %v679_v56 = vld [vmem:[%s882_s3 + $0x10] sm:$0xff]   ;;  %v681_v57 = vld [vmem:[%s882_s3 + $0x48] sm:$0xff]   ;;  %v684_v0 = vld [vmem:[%s882_s3 + $0x40] sm:$0xff]  }
   0xf   :  { %589 = vmatpush3.bf16.msra.mxu0 %v658_v10  ;;  %696 = vpow2.f32 %v289_v40  ;;  %v682_v62 = vld [vmem:[%s882_s3 + $0x8] sm:$0xff]   ;;  %v685_v6 = vld [vmem:[%s882_s3] sm:$0xff]  }
  0x10   :  { %590 = vmatprep.subr.bf16.mxu0 %v660_v11 }
  0x13   :  { %591 = vmatpush3.bf16.msra.mxu0 %v661_v15 }
  0x14   :  { %592 = vmatprep.subr.bf16.mxu0 %v664_v16  ;;  %v687_v26 = vpop.eup %686 }
  0x15   :  { %v540_v27 = vadd.f32 -1.0, %v687_v26 }
  0x17   :  { %593 = vmatpush3.bf16.msra.mxu0 %v665_v17  ;;  %v50_v28 = vsel %vm38_vm1, %v35_v13, %v540_v27 }
  0x18   :  { %594 = vmatprep.subr.bf16.mxu0 %v668_v18  ;;  %v89_v30 = vpack.c.bf16 %v50_v28, %v50_v28  ;;  %v689_v41 = vpop.eup %688 }
  0x19   :  { %v539_v43 = vadd.f32 -1.0, %v689_v41  ;;  %v691_v44 = vpop.eup %690 }
  0x1a   :  { %637 = vmatmul.mubr.msk.bf16.vlgmr.msra.gmra.mxu1 %vm198_vm2, %v89_v30  ;;  %v538_v47 = vadd.f32 -1.0, %v691_v44  ;;  %v693_v58 = vpop.eup %692 }
  0x1b   :  { %595 = vmatpush3.bf16.msra.mxu0 %v669_v19  ;;  %608 = vmatpush3.bf16.msra.mxu1 %v663_v29  ;;  %v49_v45 = vsel %vm37_vm3, %v34_v21, %v539_v43  ;;  %v695_v59 = vpop.eup %694  ;;  %v562_v60 = vadd.f32 -1.0, %v693_v58  ;;  %v24_v21 = vld [vmem:[%s886_s5] sm:$0xff] }
  0x1c   :  { %596 = vmatprep.subr.bf16.mxu0 %v672_v20  ;;  %609 = vmatprep.subr.bf16.mxu1 %v666_v31  ;;  %v88_v48 = vpack.c.bf16 %v49_v45, %v49_v45  ;;  %v48_v50 = vsel %vm36_vm4, %v33_v24, %v538_v47  ;;  %v697_v61 = vpop.eup %696  ;;  %v561_v63 = vadd.f32 -1.0, %v695_v59 }
  0x1d   :  { %v87_v52 = vpack.c.bf16 %v48_v50, %v48_v50  ;;  %v560_v2 = vadd.f32 -1.0, %v697_v61 }
  0x1e   :  { %234 = vmatprep.mubr.bf16.mxu0 %v88_v48  ;;  %v299_v4 = vsel %vm287_vm6, %v284_v35, %v561_v63 }
  0x1f   :  { %597 = vmatpush3.bf16.msra.mxu0 %v673_v22  ;;  %610 = vmatpush3.bf16.msra.mxu1 %v667_v32  ;;  %v338_v5 = vpack.c.bf16 %v299_v4, %v299_v4  ;;  %v298_v7 = vsel %vm286_vm7, %v283_v36, %v560_v2  ;;  %v537_v22 = vld [vmem:[%s885_s4] ss:$0 sm:$0xff] }
  0x20   :  { %640 = vmatprep.subr.bf16.mxu0 %v698_v1  ;;  %611 = vmatprep.subr.bf16.mxu1 %v670_v33  ;;  %v337_v8 = vpack.c.bf16 %v298_v7, %v298_v7  ;;  %v32_v25 = vadd.f32 %v537_v22, %v24_v21 }
  0x21   :  { %483 = vmatprep.mubr.bf16.mxu1 %v338_v5 }
  0x22   :  { %235 = vmatmul.mubr.bf16.vlgmr.msra.gmra.mxu0 %v87_v52 }
  0x23   :  { %612 = vmatpush3.bf16.msra.mxu1 %v671_v39  ;;  %641 = vmatpush3.bf16.msra.mxu0 %v680_v51 }
  0x24   :  { %613 = vmatprep.subr.bf16.mxu1 %v674_v42  ;;  %644 = vmatprep.mubr.msk.bf16.mxu0 %vm699_vm0, %v698_v1 }
  0x25   :  { %642 = vmatprep.subr.bf16.mxu0 %v698_v1  ;;  %v300_v1 = vsel %vm288_vm5, %v285_v34, %v562_v60 }
  0x26   :  { %v339_v3 = vpack.c.bf16 %v300_v1, %v300_v1 }
  0x27   :  { %614 = vmatpush3.bf16.msra.mxu1 %v675_v46  ;;  %643 = vmatpush3.bf16.msra.mxu0 %v683_v55 }
  0x28   :  { %615 = vmatprep.subr.bf16.mxu1 %v676_v49 }
  0x2a   :  { %645 = vmatmul.mubr.msk.bf16.vlgmr.msra.gmra.mxu0 %vm198_vm2, %v339_v3 }
  0x2b   :  { %616 = vmatpush3.bf16.msra.mxu1 %v677_v53 }
  0x2c   :  { %617 = vmatprep.subr.bf16.mxu1 %v678_v54 }
  0x2f   :  { %618 = vmatpush3.bf16.msra.mxu1 %v679_v56 }
  0x30   :  { %619 = vmatprep.subr.bf16.mxu1 %v681_v57 }
  0x33   :  { %620 = vmatpush3.bf16.msra.mxu1 %v682_v62 }
  0x34   :  { %621 = vmatprep.subr.bf16.mxu1 %v684_v0 }
  0x37   :  { %622 = vmatpush3.bf16.msra.mxu1 %v685_v6 }
  0x3a   :  { %484 = vmatmul.mubr.bf16.vlgmr.msra.gmra.mxu1 %v337_v8 }
  0xda   :  { %v276_v9 = vpop.f32.mrf.mxu1 }
  0xdc   :  { %v638_v10 = vpop.f32.mrf.mxu1 }
  0xde   :  { %v279_v11 = vpop.f32.mrf.mxu1 }
  0xe0   :  { %v639_v12 = vpop.f32.mrf.mxu1 }
  0xe2   :  { %v598_v13 = vpop.f32.mrf.mxu0 }
  0xe4   :  { %v599_v14 = vpop.f32.mrf.mxu0 }
  0xe5   :  { %v600_v19 = vadd.f32 %v599_v14, %v598_v13 }
  0xe6   :  { %v601_v15 = vpop.f32.mrf.mxu0 }
  0xe7   :  { %v277_v26 = vadd.f32 %v600_v19, %v276_v9 }
  0xe8   :  { %v602_v16 = vpop.f32.mrf.mxu0 }
  0xe9   :  { %v282_v30 = vadd.f32 %v277_v26, %v32_v25 }
  0xea   :  { %v525_v17 = vpop.f32.mrf.mxu0 }
  0xec   :  { %v646_v18 = vpop.f32.mrf.mxu0 }
  0xee   :  { %v528_v20 = vpop.f32.mrf.mxu0 }
  0xf0   :  { %v647_v23 = vpop.f32.mrf.mxu0 }
  0xfa   :  { %v623_v24 = vpop.f32.mrf.mxu1 }
  0xfc   :  { %v624_v27 = vpop.f32.mrf.mxu1 }
  0xfd   :  { %v625_v28 = vadd.f32 %v624_v27, %v623_v24 }
  0xfe   :  { %v626_v29 = vpop.f32.mrf.mxu1 }
  0xff   :  { %v526_v31 = vadd.f32 %v625_v28, %v525_v17 }
 0x100   :  { %v627_v32 = vpop.f32.mrf.mxu1 }
 0x101   :  { %v531_v33 = vadd.f32 %v526_v31, %v282_v30 }
 0x103   :  { %532 = vst.msk [vmem:[%s887_s6] sm:$0xff] %vm198_vm2, %v531_v33 }

</bundles_post_ra>
